<compile_context>
chip_gen: v5e
topology: v5e:2x2
jax: 0.10.0
libtpu: 0.0.40
codegen_flags: <defaults>
</compile_context>

<pallas_src>
import functools

import jax
import jax.numpy as jnp
from jax.experimental import pallas as pl
from jax.experimental.pallas import tpu as pltpu

_LANES = 128
_TARGET_BLOCK_BYTES = 1 << 20  # ~1 MiB per buffer; 4 buffers (in x2 + out x2)


def _sublane_pack(dtype) -> int:
    """Native sublane packing for the dtype (rows per vreg)."""
    itemsize = jnp.dtype(dtype).itemsize
    return {4: 8, 2: 16, 1: 32}.get(itemsize, 8)


def _act_q_math(x, bitA: int, out_dtype):
    """Elementwise Act_Q math (used both inside the kernel and for the tail/ref)."""
    if bitA == 32:
        return jnp.maximum(x, 0).astype(out_dtype)
    if bitA == 1:
        # sign(clamp(x, 0, 1)) == 1 where x > 0 else 0
        return jnp.where(x > 0, 1.0, 0.0).astype(out_dtype)
    n = float(2 ** bitA - 1)
    inv_n = 1.0 / n  # constant multiply instead of a VPU/EUP divide
    return (jnp.round(jnp.clip(x, 0.0, 1.0) * n) * inv_n).astype(out_dtype)


def _act_q_kernel(x_ref, o_ref, *, bitA: int):
    o_ref[...] = _act_q_math(x_ref[...], bitA, o_ref.dtype)


def act_q(x: jax.Array, bitA: int = 32) -> jax.Array:
    """Elementwise Act_Q applied via a Pallas TPU kernel."""
    orig_shape = x.shape
    dtype = x.dtype
    flat = x.reshape(-1)
    total = flat.shape[0]

    pack = _sublane_pack(dtype)
    itemsize = jnp.dtype(dtype).itemsize
    align = pack * _LANES                     # one minimal (pack, 128) tile
    main = (total // align) * align           # aligned prefix handled by Pallas

    pieces = []
    if main > 0:
        rows = main // _LANES                 # multiple of `pack`
        # ~1 MiB per block, rounded down to the dtype's native sublane packing.
        target_rows = max(
            pack, (_TARGET_BLOCK_BYTES // (_LANES * itemsize)) // pack * pack)
        block_rows = min(target_rows, rows)   # still a multiple of `pack`
        grid = (pl.cdiv(rows, block_rows),)   # partial last block is masked by Pallas

        x_main = flat if main == total else flat[:main]
        x2d = x_main.reshape(rows, _LANES)

        kernel = functools.partial(_act_q_kernel, bitA=bitA)
        out2d = pl.pallas_call(
            kernel,
            out_shape=jax.ShapeDtypeStruct((rows, _LANES), dtype),
            grid_spec=pltpu.PrefetchScalarGridSpec(
                num_scalar_prefetch=0,
                grid=grid,
                in_specs=[pl.BlockSpec((block_rows, _LANES), lambda i: (i, 0))],
                out_specs=pl.BlockSpec((block_rows, _LANES), lambda i: (i, 0)),
            ),
            compiler_params=pltpu.CompilerParams(
                dimension_semantics=("parallel",)),
        )(x2d)
        pieces.append(out2d.reshape(-1))

    if main < total:
        # Tiny (< pack*128 elements) remainder: plain jnp, no full-array pad/slice.
        pieces.append(_act_q_math(flat[main:], bitA, dtype))

    out_flat = pieces[0] if len(pieces) == 1 else jnp.concatenate(pieces)
    return out_flat.reshape(orig_shape)


if __name__ == "__main__":
    key = jax.random.PRNGKey(0)
    ok = True

    # Aligned NCHW activation: 2*4*16*16 = 2048 elements (Pallas-only path).
    x = jax.random.normal(key, (2, 4, 16, 16), dtype=jnp.float32)
    for bitA in (32, 1, 4):
        out = jax.block_until_ready(act_q(x, bitA=bitA))
        ref = _act_q_math(x, bitA, x.dtype)
        ok = ok and out.shape == x.shape and bool(jnp.allclose(out, ref, atol=1e-6))

    # Misaligned shape: 3*5*7*11 = 1155 elements -> aligned prefix kernel + jnp tail.
    x_odd = jax.random.normal(key, (3, 5, 7, 11), dtype=jnp.float32)
    for bitA in (32, 1, 3):
        out = jax.block_until_ready(act_q(x_odd, bitA=bitA))
        ref = _act_q_math(x_odd, bitA, x_odd.dtype)
        ok = ok and out.shape == x_odd.shape and bool(jnp.allclose(out, ref, atol=1e-6))

    # bf16 exercises the 16-row sublane-packed tiling path.
    x_bf16 = jax.random.normal(key, (2, 4, 16, 16), dtype=jnp.bfloat16)
    out = jax.block_until_ready(act_q(x_bf16, bitA=2))
    ref = _act_q_math(x_bf16, 2, x_bf16.dtype)
    ok = ok and out.shape == x_bf16.shape and bool(
        jnp.allclose(out.astype(jnp.float32), ref.astype(jnp.float32), atol=1e-2))

    if ok:
        print("KERNEL_OK")
</pallas_src>

<mosaic_0001>
module attributes {stable_mosaic.version = 11 : i64} {
  func.func @_act_q_kernel(%arg0: i32, %arg1: memref<16x128xf32, #tpu.memory_space<vmem>>, %arg2: memref<16x128xf32, #tpu.memory_space<vmem>>) attributes {dimension_semantics = [#tpu.dimension_semantics<parallel>], iteration_bounds = array<i64: 1>, scalar_prefetch = 0 : i64, scratch_operands = 0 : i64, tpu.core_type = #tpu.core_type<tc>, window_params = [{transform_indices = @transform_0, window_bounds = array<i64: 16, 128>}, {transform_indices = @transform_1, window_bounds = array<i64: 16, 128>}]} {
    %c0 = arith.constant 0 : index
    %c0_0 = arith.constant 0 : index
    %0 = vector.load %arg1[%c0, %c0_0] : memref<16x128xf32, #tpu.memory_space<vmem>>, vector<16x128xf32>
    %cst = arith.constant 0.000000e+00 : f32
    %1 = vector.broadcast %cst : f32 to vector<16x128xf32>
    %2 = arith.maximumf %0, %1 : vector<16x128xf32>
    %c0_1 = arith.constant 0 : index
    %c0_2 = arith.constant 0 : index
    %3 = vector.load %arg2[%c0_1, %c0_2] : memref<16x128xf32, #tpu.memory_space<vmem>>, vector<16x128xf32>
    tpu.vector_store %arg2[%c0_1, %c0_2], %2 {strides = array<i32>} : memref<16x128xf32, #tpu.memory_space<vmem>>, vector<16x128xf32>,
    return
  }
  func.func @transform_0(%arg0: i32) -> (i32, i32) {
    %c0_i32 = arith.constant 0 : i32
    %c0_i32_0 = arith.constant 0 : i32
    return %arg0, %c0_i32 : i32, i32
  }
  func.func @transform_1(%arg0: i32) -> (i32, i32) {
    %c0_i32 = arith.constant 0 : i32
    %c0_i32_0 = arith.constant 0 : i32
    return %arg0, %c0_i32 : i32, i32
  }
}

</mosaic_0001>

<bundles_post_ra>
// kernel: tpu_custom_call.1
= control target key start
LH: loop header
LB: loop body
LE: loop exit
PB: predicated region body
PF: predicated region fallthrough
CT: control target
= control target key end

     0   :  { %6 = vsyncpa [#allocation3], 0  ;;  %s126_s0 = inlined_call_operand.hbm [shape: f32[16,128], index: 0, kind: input, shape index: {}]   ;;  %s127_s1 = inlined_call_operand.hbm [shape: f32[16,128], index: 1, kind: output, shape index: {}]  }
   0x1   :  { %7 = vsyncpa [#allocation4], 0  ;;  %s12_s8 = sshll.u32 %s126_s0, 4  ;;  %s106_s9 = smov [#allocation2]   ;;  %s13_s8 = int_to_ptr.hbm [resolvable:$true] %s12_s8 }
   0x2   :  { %s14_s10 = sshll.u32 %s106_s9, 4  ;;  %s107_s11 = smov 128   ;;  %s15_s10 = int_to_ptr.vmem [resolvable:$true] %s14_s10 }
   0x3   :  { %s108_s12 = smov 8  }
   0x4   :  { %20 = dma.hbm_to_vmem [thread:$0]  %s13_s8, 256, %s15_s10, [#allocation3], %s107_s11, %s107_s11, %s108_s12  }
   0x5   :  { %102 = dma.done.wait [#allocation3], 256  }
   0x6   :  { %103 = vsyncadd [#allocation3], 4294967040  ;;  %s109_s13 = smov [#allocation5]   ;;  %s37_s17 = sshll.u32 %s127_s1, 4  ;;  %v25_v0 = vld [vmem:[#allocation2] sm:$0xff]  ;;  %v26_v1 = vld [vmem:[#allocation2 + $0x8] sm:$0xff]  ;;  %s38_s17 = int_to_ptr.hbm [resolvable:$true] %s37_s17 }
   0x7   :  { %s35_s14 = sshll.u32 %s109_s13, 4  ;;  %v27_v2 = vmax.f32 %v25_v0, 0.0  ;;  %v28_v3 = vmax.f32 %v26_v1, 0.0  ;;  %s36_s14 = int_to_ptr.vmem [resolvable:$true] %s35_s14 }
   0x9   :  { %29 = vst [vmem:[#allocation5] sm:$0xff] %v27_v2 }
   0xa   :  { %30 = vst [vmem:[#allocation5 + $0x8] sm:$0xff] %v28_v3 }
   0xb   :  { %43 = dma.vmem_to_hbm [thread:$0]  %s36_s14, 256, %s38_s17, [#allocation4], %s107_s11, %s107_s11, %s108_s12  }
   0xc   :  { %104 = dma.done.wait [#allocation4], 256  }
   0xd   :  { %105 = vsyncadd [#allocation4], 4294967040 }
   0xe   :  { %48 = vsyncpa [#allocation3], 1 }
   0xf   :  { %49 = vsyncpa [#allocation4], 1 }

</bundles_post_ra>
